<compile_context>
chip_gen: v6e
topology: v6e:2x2x1
jax: 0.10.0
libtpu: 0.0.40
codegen_flags: <defaults>
</compile_context>

<pallas_src>
import jax
import jax.numpy as jnp
from jax.experimental import pallas as pl
from jax.experimental.pallas import tpu as pltpu


def _round_up(x, m):
    return ((x + m - 1) // m) * m


def mlp_kernel(x_ref, w1_ref, b1_ref, w2_ref, b2_ref, o_ref):
    # First linear: (tm, mm) @ (mm, text), f32 accumulation on the MXU.
    h = jnp.dot(x_ref[...], w1_ref[...], preferred_element_type=jnp.float32)
    h = h + b1_ref[...]
    # SiLU(x) = x * sigmoid(x) -- keep in f32 (free on the f32 accumulator,
    # and v5e's VPU/EUP have no bf16 path).
    h = h * jax.nn.sigmoid(h)
    # Second linear: cast activation back to the weight operand dtype so the
    # MXU sees matched (bf16, bf16) operands; accumulate in f32.
    out = jnp.dot(h.astype(w2_ref.dtype), w2_ref[...],
                  preferred_element_type=jnp.float32)
    out = out + b2_ref[...]
    o_ref[...] = out.astype(o_ref.dtype)


def two_layer_mlp(x, w1, b1, w2, b2, *, tm=256, operand_dtype=jnp.bfloat16):
    """x: [..., mm_size]; w1: [mm_size, text_size] (pre-transposed, i.e. [in, out]);
    w2: [text_size, text_size]; biases are 1-D [text_size].

    operand_dtype: dtype fed to the MXU (bf16 recommended on v6e/v7x);
                   pass None or x.dtype for a full-f32 path. Accumulation is
                   always f32; biases and SiLU stay in f32.
    """
    orig_shape = x.shape
    mm_size = orig_shape[-1]
    text_size = w1.shape[1]
    out_dtype = x.dtype
    if operand_dtype is None:
        operand_dtype = x.dtype
    operand_dtype = jnp.dtype(operand_dtype)

    x2d = x.reshape(-1, mm_size)
    M = x2d.shape[0]

    # Lane-dense feature dims: pad to multiples of 128. Zero padding keeps the
    # math exact (padded input cols hit zero weight rows, padded hidden cols
    # get zero weights+bias so SiLU(0)=0, padded output cols are sliced off).
    mm_p = _round_up(mm_size, 128)
    text_p = _round_up(text_size, 128)

    # Row tile: multiple of 8 (f32) / 16 (bf16 sublane packing); don't pad tiny
    # inputs all the way to the default tile.
    row_align = 16 if operand_dtype == jnp.dtype(jnp.bfloat16) else 8
    tm_eff = max(row_align, min(_round_up(tm, row_align), _round_up(M, row_align)))
    M_p = _round_up(M, tm_eff)

    # Pad + cast operands (weight cast in the wrapper also halves HBM->VMEM DMA).
    x_p = jnp.zeros((M_p, mm_p), operand_dtype).at[:M, :mm_size].set(
        x2d.astype(operand_dtype))
    w1_p = jnp.zeros((mm_p, text_p), operand_dtype).at[:mm_size, :text_size].set(
        w1.astype(operand_dtype))
    w2_p = jnp.zeros((text_p, text_p), operand_dtype).at[:text_size, :text_size].set(
        w2.astype(operand_dtype))
    b1_p = jnp.zeros((1, text_p), jnp.float32).at[0, :text_size].set(
        b1.astype(jnp.float32))
    b2_p = jnp.zeros((1, text_p), jnp.float32).at[0, :text_size].set(
        b2.astype(jnp.float32))

    grid = (M_p // tm_eff,)

    # Rough VMEM need: double-buffered x/out tiles + single-buffered weights.
    op_b = operand_dtype.itemsize
    out_b = jnp.dtype(out_dtype).itemsize
    vmem_need = (2 * tm_eff * mm_p * op_b          # x tiles (2 buffers)
                 + 2 * tm_eff * text_p * out_b     # out tiles (2 buffers)
                 + mm_p * text_p * op_b            # w1 (1 buffer)
                 + text_p * text_p * op_b          # w2 (1 buffer)
                 + 2 * text_p * 4)                 # biases
    vmem_limit = int(min(max(2 * vmem_need, 32 * 1024 * 1024),
                         100 * 1024 * 1024))

    out = pl.pallas_call(
        mlp_kernel,
        out_shape=jax.ShapeDtypeStruct((M_p, text_p), out_dtype),
        grid_spec=pltpu.PrefetchScalarGridSpec(
            num_scalar_prefetch=0,
            grid=grid,
            in_specs=[
                # Streaming row tiles of x: default double-buffering.
                pl.BlockSpec((tm_eff, mm_p), lambda i: (i, 0)),
                # Constant-index weights/biases: single-buffered (resident).
                pl.BlockSpec((mm_p, text_p), lambda i: (0, 0),
                             pipeline_mode=pl.Buffered(1)),
                pl.BlockSpec((1, text_p), lambda i: (0, 0),
                             pipeline_mode=pl.Buffered(1)),
                pl.BlockSpec((text_p, text_p), lambda i: (0, 0),
                             pipeline_mode=pl.Buffered(1)),
                pl.BlockSpec((1, text_p), lambda i: (0, 0),
                             pipeline_mode=pl.Buffered(1)),
            ],
            out_specs=pl.BlockSpec((tm_eff, text_p), lambda i: (i, 0)),
        ),
        compiler_params=pltpu.CompilerParams(
            dimension_semantics=("parallel",),
            vmem_limit_bytes=vmem_limit,
        ),
    )(x_p, w1_p, b1_p, w2_p, b2_p)

    out = out[:M, :text_size]
    return out.reshape(*orig_shape[:-1], text_size)


def init_params(key, mm_size, text_size, dtype=jnp.float32):
    """Deterministic init mimicking nn.Linear's uniform(-1/sqrt(fan_in), 1/sqrt(fan_in))."""
    k1, k2, k3, k4 = jax.random.split(key, 4)
    lim1 = 1.0 / (mm_size ** 0.5)
    lim2 = 1.0 / (text_size ** 0.5)
    # Stored already transposed: [in, out]
    w1 = jax.random.uniform(k1, (mm_size, text_size), dtype, -lim1, lim1)
    b1 = jax.random.uniform(k2, (text_size,), dtype, -lim1, lim1)
    w2 = jax.random.uniform(k3, (text_size, text_size), dtype, -lim2, lim2)
    b2 = jax.random.uniform(k4, (text_size,), dtype, -lim2, lim2)
    return w1, b1, w2, b2


if __name__ == "__main__":
    mm_size, text_size = 32, 64
    batch, seq = 2, 8

    key = jax.random.PRNGKey(0)
    kx, kp = jax.random.split(key)
    x = jax.random.normal(kx, (batch, seq, mm_size), dtype=jnp.float32)
    w1, b1, w2, b2 = init_params(kp, mm_size, text_size)

    # Pure-JAX reference.
    h_ref = x @ w1 + b1
    h_ref = h_ref * jax.nn.sigmoid(h_ref)
    ref = h_ref @ w2 + b2

    # 1) Exact-path check (f32 operands) -- validates kernel logic / padding.
    out_f32 = jax.block_until_ready(
        two_layer_mlp(x, w1, b1, w2, b2, operand_dtype=jnp.float32))
    assert out_f32.shape == (batch, seq, text_size)
    assert jnp.allclose(out_f32, ref, atol=1e-4, rtol=1e-4)

    # 2) Fast path (bf16 operands, f32 accumulation) -- default configuration.
    out = jax.block_until_ready(two_layer_mlp(x, w1, b1, w2, b2))
    assert out.shape == (batch, seq, text_size)
    assert jnp.allclose(out, ref, atol=5e-2, rtol=5e-2)

    print("KERNEL_OK")
</pallas_src>

<mosaic_0001>
module attributes {stable_mosaic.version = 11 : i64} {
  func.func @mlp_kernel(%arg0: i32, %arg1: memref<16x128xf32, #tpu.memory_space<vmem>>, %arg2: memref<128x128xf32, #tpu.memory_space<vmem>>, %arg3: memref<1x128xf32, #tpu.memory_space<vmem>>, %arg4: memref<128x128xf32, #tpu.memory_space<vmem>>, %arg5: memref<1x128xf32, #tpu.memory_space<vmem>>, %arg6: memref<16x128xf32, #tpu.memory_space<vmem>>) attributes {dimension_semantics = [#tpu.dimension_semantics<parallel>], iteration_bounds = array<i64: 1>, scalar_prefetch = 0 : i64, scratch_operands = 0 : i64, tpu.core_type = #tpu.core_type<tc>, window_params = [{transform_indices = @transform_0, window_bounds = array<i64: 16, 128>}, {pipeline_mode = #tpu.pipeline_mode<synchronous>, transform_indices = @transform_1, window_bounds = array<i64: 128, 128>}, {pipeline_mode = #tpu.pipeline_mode<synchronous>, transform_indices = @transform_2, window_bounds = array<i64: 1, 128>}, {pipeline_mode = #tpu.pipeline_mode<synchronous>, transform_indices = @transform_3, window_bounds = array<i64: 128, 128>}, {pipeline_mode = #tpu.pipeline_mode<synchronous>, transform_indices = @transform_4, window_bounds = array<i64: 1, 128>}, {transform_indices = @transform_5, window_bounds = array<i64: 16, 128>}]} {
    %c0 = arith.constant 0 : index
    %c0_0 = arith.constant 0 : index
    %0 = vector.load %arg1[%c0, %c0_0] : memref<16x128xf32, #tpu.memory_space<vmem>>, vector<16x128xf32>
    %c0_1 = arith.constant 0 : index
    %c0_2 = arith.constant 0 : index
    %1 = vector.load %arg2[%c0_1, %c0_2] : memref<128x128xf32, #tpu.memory_space<vmem>>, vector<128x128xf32>
    %cst = arith.constant dense<0.000000e+00> : vector<16x128xf32>
    %2 = tpu.matmul %0, %1, %cst {dimension_numbers = #tpu.dot_dimension_numbers<[1], [0], [0], [1], [0, 0, 1, 1], [], []>} : vector<16x128xf32>, vector<128x128xf32>, vector<16x128xf32> -> vector<16x128xf32>
    %c0_3 = arith.constant 0 : index
    %c0_4 = arith.constant 0 : index
    %3 = vector.load %arg3[%c0_3, %c0_4] : memref<1x128xf32, #tpu.memory_space<vmem>>, vector<1x128xf32>
    %4 = vector.broadcast %3 : vector<1x128xf32> to vector<16x128xf32>
    %5 = arith.addf %2, %4 : vector<16x128xf32>
    %6 = arith.negf %5 : vector<16x128xf32>
    %7 = math.exp %6 : vector<16x128xf32>
    %cst_5 = arith.constant 1.000000e+00 : f32
    %8 = vector.broadcast %cst_5 : f32 to vector<16x128xf32>
    %9 = arith.addf %8, %7 : vector<16x128xf32>
    %10 = arith.divf %8, %9 : vector<16x128xf32>
    %11 = arith.mulf %5, %10 : vector<16x128xf32>
    %c0_6 = arith.constant 0 : index
    %c0_7 = arith.constant 0 : index
    %12 = vector.load %arg4[%c0_6, %c0_7] : memref<128x128xf32, #tpu.memory_space<vmem>>, vector<128x128xf32>
    %cst_8 = arith.constant dense<0.000000e+00> : vector<16x128xf32>
    %13 = tpu.matmul %11, %12, %cst_8 {dimension_numbers = #tpu.dot_dimension_numbers<[1], [0], [0], [1], [0, 0, 1, 1], [], []>} : vector<16x128xf32>, vector<128x128xf32>, vector<16x128xf32> -> vector<16x128xf32>
    %c0_9 = arith.constant 0 : index
    %c0_10 = arith.constant 0 : index
    %14 = vector.load %arg5[%c0_9, %c0_10] : memref<1x128xf32, #tpu.memory_space<vmem>>, vector<1x128xf32>
    %15 = vector.broadcast %14 : vector<1x128xf32> to vector<16x128xf32>
    %16 = arith.addf %13, %15 : vector<16x128xf32>
    %c0_11 = arith.constant 0 : index
    %c0_12 = arith.constant 0 : index
    %17 = vector.load %arg6[%c0_11, %c0_12] : memref<16x128xf32, #tpu.memory_space<vmem>>, vector<16x128xf32>
    tpu.vector_store %arg6[%c0_11, %c0_12], %16 {strides = array<i32>} : memref<16x128xf32, #tpu.memory_space<vmem>>, vector<16x128xf32>,
    return
  }
  func.func @transform_0(%arg0: i32) -> (i32, i32) {
    %c0_i32 = arith.constant 0 : i32
    %c0_i32_0 = arith.constant 0 : i32
    return %arg0, %c0_i32 : i32, i32
  }
  func.func @transform_1(%arg0: i32) -> (i32, i32) {
    %c0_i32 = arith.constant 0 : i32
    %c0_i32_0 = arith.constant 0 : i32
    %c0_i32_1 = arith.constant 0 : i32
    return %c0_i32, %c0_i32_0 : i32, i32
  }
  func.func @transform_2(%arg0: i32) -> (i32, i32) {
    %c0_i32 = arith.constant 0 : i32
    %c0_i32_0 = arith.constant 0 : i32
    %c0_i32_1 = arith.constant 0 : i32
    return %c0_i32, %c0_i32_0 : i32, i32
  }
  func.func @transform_3(%arg0: i32) -> (i32, i32) {
    %c0_i32 = arith.constant 0 : i32
    %c0_i32_0 = arith.constant 0 : i32
    %c0_i32_1 = arith.constant 0 : i32
    return %c0_i32, %c0_i32_0 : i32, i32
  }
  func.func @transform_4(%arg0: i32) -> (i32, i32) {
    %c0_i32 = arith.constant 0 : i32
    %c0_i32_0 = arith.constant 0 : i32
    %c0_i32_1 = arith.constant 0 : i32
    return %c0_i32, %c0_i32_0 : i32, i32
  }
  func.func @transform_5(%arg0: i32) -> (i32, i32) {
    %c0_i32 = arith.constant 0 : i32
    %c0_i32_0 = arith.constant 0 : i32
    return %arg0, %c0_i32 : i32, i32
  }
}

</mosaic_0001>

<bundles_post_ra>
// kernel: tpu_custom_call.1
= control target key start
LH: loop header
LB: loop body
LE: loop exit
PB: predicated region body
PF: predicated region fallthrough
CT: control target
= control target key end

     0   :  { %10 = vsyncpa [#allocation3], 0  ;;  %s570_s0 = inlined_call_operand.hbm [shape: f32[16,128], index: 0, kind: input, shape index: {}]   ;;  %s571_s1 = inlined_call_operand.hbm [shape: f32[128,128], index: 1, kind: input, shape index: {}]   ;;  %s572_s2 = inlined_call_operand.vmem [shape: f32[1,128], index: 2, kind: input, shape index: {}]   ;;  %s573_s3 = inlined_call_operand.hbm [shape: f32[128,128], index: 3, kind: input, shape index: {}]   ;;  %s574_s4 = inlined_call_operand.vmem [shape: f32[1,128], index: 4, kind: input, shape index: {}]   ;;  %s575_s5 = inlined_call_operand.hbm [shape: f32[16,128], index: 5, kind: output, shape index: {}]  }
   0x1   :  { %11 = vsyncpa [#allocation6], 0 }
   0x2   :  { %12 = vsyncpa [#allocation4], 0  ;;  %s504_s18 = smov [#allocation5]   ;;  %s505_s20 = smov [#allocation2]  }
   0x3   :  { %s30_s19 = sshll.u32 %s504_s18, 4  ;;  %s18_s21 = sshll.u32 %s505_s20, 4  ;;  %s31_s19 = int_to_ptr.vmem [resolvable:$true] %s30_s19  ;;  %s19_s21 = int_to_ptr.vmem [resolvable:$true] %s18_s21 }
   0x4   :  { %s426_s22 = scalar_lea.vmem %s31_s19, 2048  ;;  %p431_p1 = scmp.lt.s32.totalorder %s31_s19, %s31_s19 }
   0x5   :  { %p427_p0 = scmp.ne.s32.totalorder %s31_s19, %s426_s22  ;;  %p432_p2 = scmp.lt.s32.totalorder %s426_s22, %s426_s22 }
   0x7   :  { %p433_p3 = por %p432_p2, %p431_p1 }
   0x9   :  { %p434_p4 = pnand %p433_p3, %p427_p0 }
   0xb   :  { %437 = shalt.err (!%p434_p4)
}
   0xc   :  { %s506_s23 = smov 128   ;;  %s507_s24 = smov 8  }
   0xd   :  { %36 = dma.hbm_to_vmem [thread:$0]  %s571_s1, 2048, %s31_s19, [#allocation6], %s506_s23, %s506_s23, %s507_s24  }
   0xe   :  { %s446_s27 = scalar_lea.vmem %s19_s21, 256  ;;  %p451_p6 = scmp.lt.s32.totalorder %s19_s21, %s19_s21 }
   0xf   :  { %p447_p5 = scmp.ne.s32.totalorder %s19_s21, %s446_s27  ;;  %p452_p7 = scmp.lt.s32.totalorder %s446_s27, %s446_s27 }
  0x11   :  { %p453_p8 = por %p452_p7, %p451_p6 }
  0x13   :  { %p454_p9 = pnand %p453_p8, %p447_p5 }
  0x15   :  { %457 = shalt.err (!%p454_p9)
}
  0x16   :  { %24 = dma.hbm_to_vmem [thread:$0]  %s570_s0, 256, %s19_s21, [#allocation3], %s506_s23, %s506_s23, %s507_s24  }
  0x17   :  { %s508_s30 = smov [#allocation7]  }
  0x18   :  { %s44_s6 = sshll.u32 %s508_s30, 4  ;;  %s45_s6 = int_to_ptr.vmem [resolvable:$true] %s44_s6 }
  0x19   :  { %s466_s7 = scalar_lea.vmem %s45_s6, 2048  ;;  %p471_p11 = scmp.lt.s32.totalorder %s45_s6, %s45_s6 }
  0x1a   :  { %p467_p10 = scmp.ne.s32.totalorder %s45_s6, %s466_s7  ;;  %p472_p12 = scmp.lt.s32.totalorder %s466_s7, %s466_s7 }
  0x1c   :  { %p473_p13 = por %p472_p12, %p471_p11 }
  0x1e   :  { %p474_p0 = pnand %p473_p13, %p467_p10 }
  0x20   :  { %477 = shalt.err (!%p474_p0)
}
  0x21   :  { %50 = dma.hbm_to_vmem [thread:$0]  %s573_s3, 2048, %s45_s6, [#allocation6], %s506_s23, %s506_s23, %s507_s24  }
  0x22   :  { %498 = dma.done.wait [#allocation3], 256  }
  0x23   :  { %499 = vsyncadd [#allocation3], 4294967040 }
  0x24   :  { %500 = dma.done.wait [#allocation6], 4096  }
  0x25   :  { %501 = vsyncadd [#allocation6], 4294963200  ;;  %v79_v0 = vld [vmem:[#allocation5 + $0x78] sm:$0xff]  ;;  %v78_v1 = vld [vmem:[#allocation5 + $0x70] sm:$0xff]  ;;  %s509_s10 = smov [#allocation8]  }
  0x26   :  { %334 = vmatprep.subr.mxu0 %v79_v0  ;;  %v77_v2 = vld [vmem:[#allocation5 + $0x68] sm:$0xff]  ;;  %v76_v3 = vld [vmem:[#allocation5 + $0x60] sm:$0xff]  ;;  %v62_v4 = vld [vmem:[#allocation2] sm:$0xff]  ;;  %s281_s11 = sshll.u32 %s509_s10, 4  ;;  %s282_s11 = int_to_ptr.vmem [resolvable:$true] %s281_s11 }
  0x27   :  { %335 = vmatpush3.msra.mxu0 %v79_v0  ;;  %v75_v5 = vld [vmem:[#allocation5 + $0x58] sm:$0xff]  ;;  %366 = vmatprep.mubr.f32.mxu0 %v62_v4  ;;  %v74_v6 = vld [vmem:[#allocation5 + $0x50] sm:$0xff]  ;;  %v73_v7 = vld [vmem:[#allocation5 + $0x48] sm:$0xff]  ;;  %s478_s12 = scalar_lea.vmem %s282_s11, 256  ;;  %p483_p2 = scmp.lt.s32.totalorder %s282_s11, %s282_s11 }
  0x28   :  { %336 = vmatprep.subr.mxu0 %v78_v1  ;;  %v72_v8 = vld [vmem:[#allocation5 + $0x40] sm:$0xff]  ;;  %v71_v9 = vld [vmem:[#allocation5 + $0x38] sm:$0xff]  ;;  %v70_v10 = vld [vmem:[#allocation5 + $0x30] sm:$0xff]  ;;  %p479_p1 = scmp.ne.s32.totalorder %s282_s11, %s478_s12  ;;  %p484_p3 = scmp.lt.s32.totalorder %s478_s12, %s478_s12 }
  0x29   :  { %337 = vmatpush3.msra.mxu0 %v78_v1  ;;  %v69_v11 = vld [vmem:[#allocation5 + $0x28] sm:$0xff]  ;;  %v68_v12 = vld [vmem:[#allocation5 + $0x20] sm:$0xff]  ;;  %v67_v13 = vld [vmem:[#allocation5 + $0x18] sm:$0xff] }
  0x2a   :  { %338 = vmatprep.subr.mxu0 %v77_v2  ;;  %v66_v14 = vld [vmem:[#allocation5 + $0x10] sm:$0xff]  ;;  %v65_v15 = vld [vmem:[#allocation5 + $0x8] sm:$0xff]  ;;  %v64_v16 = vld [vmem:[#allocation5] sm:$0xff]  ;;  %p485_p4 = por %p484_p3, %p483_p2 }
  0x2b   :  { %339 = vmatpush3.msra.mxu0 %v77_v2  ;;  %v63_v17 = vld [vmem:[#allocation2 + $0x8] sm:$0xff]  ;;  %v190_v19 = vld [vmem:[#allocation7 + $0x70] sm:$0xff]  ;;  %v189_v20 = vld [vmem:[#allocation7 + $0x68] sm:$0xff] }
  0x2c   :  { %340 = vmatprep.subr.mxu0 %v76_v3  ;;  %v191_v18 = vld [vmem:[#allocation7 + $0x78] sm:$0xff]  ;;  %v188_v21 = vld [vmem:[#allocation7 + $0x60] sm:$0xff]  ;;  %v186_v23 = vld [vmem:[#allocation7 + $0x50] sm:$0xff]  ;;  %p486_p5 = pnand %p485_p4, %p479_p1 }
  0x2d   :  { %341 = vmatpush3.msra.mxu0 %v76_v3  ;;  %369 = vmatprep.subr.mxu1 %v191_v18  ;;  %v187_v22 = vld [vmem:[#allocation7 + $0x58] sm:$0xff]  ;;  %v185_v24 = vld [vmem:[#allocation7 + $0x48] sm:$0xff]  ;;  %v184_v25 = vld [vmem:[#allocation7 + $0x40] sm:$0xff] }
  0x2e   :  { %342 = vmatprep.subr.mxu0 %v75_v5  ;;  %370 = vmatpush3.msra.mxu1 %v191_v18  ;;  %v183_v26 = vld [vmem:[#allocation7 + $0x38] sm:$0xff]  ;;  %v182_v27 = vld [vmem:[#allocation7 + $0x30] sm:$0xff]  ;;  %v181_v28 = vld [vmem:[#allocation7 + $0x28] sm:$0xff] }
  0x2f   :  { %343 = vmatpush3.msra.mxu0 %v75_v5  ;;  %371 = vmatprep.subr.mxu1 %v190_v19  ;;  %v180_v29 = vld [vmem:[#allocation7 + $0x20] sm:$0xff]  ;;  %v179_v30 = vld [vmem:[#allocation7 + $0x18] sm:$0xff]  ;;  %v178_v31 = vld [vmem:[#allocation7 + $0x10] sm:$0xff] }
  0x30   :  { %344 = vmatprep.subr.mxu0 %v74_v6  ;;  %372 = vmatpush3.msra.mxu1 %v190_v19  ;;  %v177_v32 = vld [vmem:[#allocation7 + $0x8] sm:$0xff]  ;;  %v176_v33 = vld [vmem:[#allocation7] sm:$0xff]  ;;  %v294_v34 = vld [vmem:[%s572_s2] ss:$0 sm:$0xff] }
  0x31   :  { %345 = vmatpush3.msra.mxu0 %v74_v6  ;;  %373 = vmatprep.subr.mxu1 %v189_v20  ;;  %v297_v49 = vld [vmem:[%s574_s4] ss:$0 sm:$0xff] }
  0x32   :  { %346 = vmatprep.subr.mxu0 %v73_v7  ;;  %374 = vmatpush3.msra.mxu1 %v189_v20 }
  0x33   :  { %347 = vmatpush3.msra.mxu0 %v73_v7  ;;  %375 = vmatprep.subr.mxu1 %v188_v21 }
  0x34   :  { %348 = vmatprep.subr.mxu0 %v72_v8  ;;  %376 = vmatpush3.msra.mxu1 %v188_v21 }
  0x35   :  { %349 = vmatpush3.msra.mxu0 %v72_v8  ;;  %377 = vmatprep.subr.mxu1 %v187_v22 }
  0x36   :  { %350 = vmatprep.subr.mxu0 %v71_v9  ;;  %378 = vmatpush3.msra.mxu1 %v187_v22 }
  0x37   :  { %351 = vmatpush3.msra.mxu0 %v71_v9  ;;  %379 = vmatprep.subr.mxu1 %v186_v23 }
  0x38   :  { %352 = vmatprep.subr.mxu0 %v70_v10  ;;  %380 = vmatpush3.msra.mxu1 %v186_v23 }
  0x39   :  { %353 = vmatpush3.msra.mxu0 %v70_v10  ;;  %381 = vmatprep.subr.mxu1 %v185_v24 }
  0x3a   :  { %354 = vmatprep.subr.mxu0 %v69_v11  ;;  %382 = vmatpush3.msra.mxu1 %v185_v24 }
  0x3b   :  { %355 = vmatpush3.msra.mxu0 %v69_v11  ;;  %383 = vmatprep.subr.mxu1 %v184_v25 }
  0x3c   :  { %356 = vmatprep.subr.mxu0 %v68_v12  ;;  %384 = vmatpush3.msra.mxu1 %v184_v25 }
  0x3d   :  { %357 = vmatpush3.msra.mxu0 %v68_v12  ;;  %385 = vmatprep.subr.mxu1 %v183_v26 }
  0x3e   :  { %358 = vmatprep.subr.mxu0 %v67_v13  ;;  %386 = vmatpush3.msra.mxu1 %v183_v26 }
  0x3f   :  { %359 = vmatpush3.msra.mxu0 %v67_v13  ;;  %387 = vmatprep.subr.mxu1 %v182_v27 }
  0x40   :  { %360 = vmatprep.subr.mxu0 %v66_v14  ;;  %388 = vmatpush3.msra.mxu1 %v182_v27 }
  0x41   :  { %361 = vmatpush3.msra.mxu0 %v66_v14  ;;  %389 = vmatprep.subr.mxu1 %v181_v28 }
  0x42   :  { %362 = vmatprep.subr.mxu0 %v65_v15  ;;  %390 = vmatpush3.msra.mxu1 %v181_v28 }
  0x43   :  { %363 = vmatpush3.msra.mxu0 %v65_v15  ;;  %391 = vmatprep.subr.mxu1 %v180_v29 }
  0x44   :  { %364 = vmatprep.subr.mxu0 %v64_v16  ;;  %392 = vmatpush3.msra.mxu1 %v180_v29 }
  0x45   :  { %365 = vmatpush3.msra.mxu0 %v64_v16  ;;  %393 = vmatprep.subr.mxu1 %v179_v30 }
  0x46   :  { %367 = vmatmul.mubr.f32.vlgmr.msra.gmra.mxu0 %v63_v17  ;;  %394 = vmatpush3.msra.mxu1 %v179_v30 }
  0x47   :  { %395 = vmatprep.subr.mxu1 %v178_v31 }
  0x48   :  { %396 = vmatpush3.msra.mxu1 %v178_v31 }
  0x49   :  { %397 = vmatprep.subr.mxu1 %v177_v32 }
  0x4a   :  { %398 = vmatpush3.msra.mxu1 %v177_v32 }
  0x4b   :  { %399 = vmatprep.subr.mxu1 %v176_v33 }
  0x4c   :  { %400 = vmatpush3.msra.mxu1 %v176_v33 }
 0x106   :  { %v368_v35 = vpop.f32.mrf.mxu0 }
 0x107   :  { %v159_v36 = vadd.f32 %v368_v35, %v294_v34 }
 0x108   :  { %v153_v37 = vpop.f32.mrf.mxu0 }
 0x109   :  { %v296_v38 = vmul.f32 -1.442695, %v159_v36  ;;  %v154_v39 = vadd.f32 %v294_v34, %v153_v37 }
 0x10b   :  { %410 = vpow2.f32 %v296_v38  ;;  %v295_v40 = vmul.f32 -1.442695, %v154_v39 }
 0x10d   :  { %412 = vpow2.f32 %v295_v40 }
 0x118   :  { %v411_v41 = vpop.eup %410 }
 0x119   :  { %v169_v42 = vadd.f32 1.0, %v411_v41 }
 0x11a   :  { %v413_v43 = vpop.eup %412 }
 0x11b   :  { %v168_v44 = vadd.f32 1.0, %v413_v43  ;;  %414 = vrcp.f32 %v169_v42 }
 0x11d   :  { %416 = vrcp.f32 %v168_v44 }
 0x128   :  { %v415_v45 = vpop.eup %414 }
 0x129   :  { %v175_v48 = vmul.f32 %v415_v45, %v159_v36 }
 0x12a   :  { %v417_v46 = vpop.eup %416 }
 0x12b   :  { %v174_v47 = vmul.f32 %v417_v46, %v154_v39 }
 0x12d   :  { %401 = vmatprep.mubr.f32.mxu1 %v174_v47 }
 0x12e   :  { %402 = vmatmul.mubr.f32.vlgmr.msra.gmra.mxu1 %v175_v48 }
 0x1ee   :  { %v403_v50 = vpop.f32.mrf.mxu1 }
 0x1ef   :  { %v271_v51 = vadd.f32 %v403_v50, %v297_v49 }
 0x1f0   :  { %v265_v52 = vpop.f32.mrf.mxu1 }
 0x1f1   :  { %275 = vst [vmem:[#allocation8 + $0x8] sm:$0xff] %v271_v51  ;;  %v266_v53 = vadd.f32 %v297_v49, %v265_v52 }
 0x1f3   :  { %274 = vst [vmem:[#allocation8] sm:$0xff] %v266_v53 }
 0x1f4   :  { %489 = shalt.err (!%p486_p5)
}
 0x1f5   :  { %287 = dma.vmem_to_hbm [thread:$0]  %s282_s11, 256, %s575_s5, [#allocation4], %s506_s23, %s506_s23, %s507_s24  }
 0x1f6   :  { %502 = dma.done.wait [#allocation4], 256  }
 0x1f7   :  { %503 = vsyncadd [#allocation4], 4294967040 }
 0x1f8   :  { %291 = vsyncpa [#allocation3], 1 }
 0x1f9   :  { %292 = vsyncpa [#allocation6], 1 }
 0x1fa   :  { %293 = vsyncpa [#allocation4], 1 }

</bundles_post_ra>
